<compile_context>
chip_gen: v6e
topology: v6e:2x2x1
jax: 0.10.0
libtpu: 0.0.40
codegen_flags: <defaults>
</compile_context>

<pallas_src>
import functools

import jax
import jax.numpy as jnp
from jax.experimental import pallas as pl
from jax.experimental.pallas import tpu as pltpu


# ---------------------------------------------------------------------------
# Fused forward kernel: all weights + intermediates stay in VMEM per grid step.
# ---------------------------------------------------------------------------
def _mlp_al_kernel(x1_ref, x2_ref,              # [tb, 196] bf16 per branch
                   w1_ref, b1_ref,              # [2, 196, H1] bf16, [2, 1, H1] f32
                   w2_ref, b2_ref,              # [2, H1, H2] bf16, [2, 1, H2] f32
                   w3_ref, b3_ref,              # [2*H2, 20] bf16 block-diag, [1, 20] f32
                   w4_ref, b4_ref,              # [20, H4] bf16, [1, H4] f32
                   w5_ref, b5_ref,              # [H4, 2] bf16, [1, 2] f32
                   out_ref):                    # [tb, 22] f32  = [y | z | w]
    f32 = jnp.float32
    bf16 = jnp.bfloat16

    def branch(x_ref, g):
        # fc1_g -> relu -> fc2_g -> relu     (bf16 operands, f32 accumulate)
        h = jnp.dot(x_ref[...], w1_ref[g], preferred_element_type=f32)
        h = jnp.maximum(h + b1_ref[g], 0.0)
        h = jnp.dot(h.astype(bf16), w2_ref[g], preferred_element_type=f32)
        return jnp.maximum(h + b2_ref[g], 0.0)            # [tb, H2] f32

    h1 = branch(x1_ref, 0)
    h2 = branch(x2_ref, 1)

    # fc3_1 / fc3_2 fused as one block-diagonal matmul: yz = [y | z], [tb, 20].
    hcat = jnp.concatenate([h1, h2], axis=-1).astype(bf16)    # 128-lane boundary concat
    yz = jnp.dot(hcat, w3_ref[...], preferred_element_type=f32) + b3_ref[...]

    # fc4 (on relu(y)|relu(z)) -> relu -> fc5
    uv = jnp.maximum(yz, 0.0).astype(bf16)
    h4 = jnp.dot(uv, w4_ref[...], preferred_element_type=f32) + b4_ref[...]
    h4 = jnp.maximum(h4, 0.0).astype(bf16)
    w = jnp.dot(h4, w5_ref[...], preferred_element_type=f32) + b5_ref[...]

    # Single consolidated output store:  columns [0:20] = yz, [20:22] = w.
    out_ref[...] = jnp.concatenate([yz, w], axis=-1).astype(out_ref.dtype)


# ---------------------------------------------------------------------------
# Batch-tile selection: large (up to 1024) 8-aligned power-of-two tiles, but at
# least 2 grid steps for B >= 16 so v7x megacore gets both TensorCores working.
# ---------------------------------------------------------------------------
def _pick_batch_tile(B):
    if B < 16:
        return B                      # single step for tiny batches
    cap = min(1024, B // 2)
    tb = 8
    while tb * 2 <= cap:
        tb *= 2
    return tb


def mlp_al_forward(x, p):
    """x: [B, 2, 14, 14] (digit pair) -> (w [B,2], y [B,10], z [B,10])."""
    B = x.shape[0]
    # Two branch planes as separate [B, 196] bf16 inputs (strided slice + cast,
    # no full permute of the stacked tensor).
    xr = x.reshape(B, 2, 196).astype(jnp.bfloat16)
    x1, x2 = xr[:, 0], xr[:, 1]

    tb = _pick_batch_tile(B)
    Bp = pl.cdiv(B, tb) * tb
    if Bp != B:                       # pad batch to a tile multiple (sliced off below)
        pad = ((0, Bp - B), (0, 0))
        x1 = jnp.pad(x1, pad)
        x2 = jnp.pad(x2, pad)
    grid = (Bp // tb,)

    def wspec(arr):
        nd = arr.ndim
        return pl.BlockSpec(arr.shape, lambda i, _nd=nd: (0,) * _nd)

    in_specs = [
        pl.BlockSpec((tb, 196), lambda i: (i, 0)),
        pl.BlockSpec((tb, 196), lambda i: (i, 0)),
        wspec(p["w1"]), wspec(p["b1"]),
        wspec(p["w2"]), wspec(p["b2"]),
        wspec(p["w3"]), wspec(p["b3"]),
        wspec(p["w4"]), wspec(p["b4"]),
        wspec(p["w5"]), wspec(p["b5"]),
    ]
    out_spec = pl.BlockSpec((tb, 22), lambda i: (i, 0))
    out_shape = jax.ShapeDtypeStruct((Bp, 22), jnp.float32)

    # Advisory cost estimate.
    h1d, h2d, h4d = p["w1"].shape[2], p["w2"].shape[2], p["w4"].shape[1]
    macs = 2 * (196 * h1d + h1d * h2d) + (2 * h2d) * 20 + 20 * h4d + h4d * 2
    nparam_bytes = sum(int(v.size) * v.dtype.itemsize for v in p.values())
    cost = pl.CostEstimate(
        flops=2 * Bp * macs,
        transcendentals=0,
        bytes_accessed=2 * Bp * 196 * 2 + nparam_bytes + Bp * 22 * 4,
    )

    out = pl.pallas_call(
        _mlp_al_kernel,
        out_shape=out_shape,
        grid=grid,
        in_specs=in_specs,
        out_specs=out_spec,
        compiler_params=pltpu.CompilerParams(
            dimension_semantics=("parallel",),
            vmem_limit_bytes=48 * 1024 * 1024,
        ),
        cost_estimate=cost,
    )(x1, x2, p["w1"], p["b1"], p["w2"], p["b2"], p["w3"], p["b3"],
      p["w4"], p["b4"], p["w5"], p["b5"])

    out = out[:B]
    return out[:, 20:22], out[:, :10], out[:, 10:20]       # (w, y, z)


# ---------------------------------------------------------------------------
# Parameter init (PyTorch nn.Linear-style uniform bounds), pre-packed for the
# kernel: weights transposed to [in, out] and stored bf16; biases [1, out] f32;
# branch pairs stacked on a leading axis; fc3_1/fc3_2 pre-packed into one
# block-diagonal [2*H2, 20] matrix.  All hoisted out of the traced forward.
# ---------------------------------------------------------------------------
def init_params(key, nb_hidden1=256, nb_hidden4=100):
    h1, h2, h4 = nb_hidden1, nb_hidden1 // 2, nb_hidden4

    def uinit(k, shape, fan_in):
        bound = 1.0 / jnp.sqrt(float(fan_in))
        return jax.random.uniform(k, shape, jnp.float32, -bound, bound)

    ks = jax.random.split(key, 16)
    w1 = jnp.stack([uinit(ks[0], (196, h1), 196), uinit(ks[1], (196, h1), 196)])
    b1 = jnp.stack([uinit(ks[2], (1, h1), 196), uinit(ks[3], (1, h1), 196)])
    w2 = jnp.stack([uinit(ks[4], (h1, h2), h1), uinit(ks[5], (h1, h2), h1)])
    b2 = jnp.stack([uinit(ks[6], (1, h2), h1), uinit(ks[7], (1, h2), h1)])
    w3_1 = uinit(ks[8], (h2, 10), h2)
    w3_2 = uinit(ks[9], (h2, 10), h2)
    b3_1 = uinit(ks[10], (1, 10), h2)
    b3_2 = uinit(ks[11], (1, 10), h2)
    w4 = uinit(ks[12], (20, h4), 20)
    b4 = uinit(ks[13], (1, h4), 20)
    w5 = uinit(ks[14], (h4, 2), h4)
    b5 = uinit(ks[15], (1, 2), h4)

    # Block-diagonal fc3:  [h1 | h2] @ w3_bd  ==  [h1 @ w3_1 | h2 @ w3_2].
    w3_bd = jnp.zeros((2 * h2, 20), jnp.float32)
    w3_bd = w3_bd.at[:h2, :10].set(w3_1).at[h2:, 10:].set(w3_2)
    b3 = jnp.concatenate([b3_1, b3_2], axis=-1)

    bf = jnp.bfloat16
    return {
        "w1": w1.astype(bf), "b1": b1,
        "w2": w2.astype(bf), "b2": b2,
        "w3": w3_bd.astype(bf), "b3": b3,
        "w4": w4.astype(bf), "b4": b4,
        "w5": w5.astype(bf), "b5": b5,
    }


# ---------------------------------------------------------------------------
# Pure-JAX reference with identical precision (bf16 operands, f32 accumulate)
# for the correctness check.
# ---------------------------------------------------------------------------
def mlp_al_reference(x, p):
    B = x.shape[0]
    bf16, f32 = jnp.bfloat16, jnp.float32
    xr = x.reshape(B, 2, 196).astype(bf16)

    def dot(a, b):
        return jnp.dot(a, b, preferred_element_type=f32)

    def branch(g):
        h = jnp.maximum(dot(xr[:, g], p["w1"][g]) + p["b1"][g], 0.0)
        h = jnp.maximum(dot(h.astype(bf16), p["w2"][g]) + p["b2"][g], 0.0)
        return h

    hcat = jnp.concatenate([branch(0), branch(1)], axis=-1).astype(bf16)
    yz = dot(hcat, p["w3"]) + p["b3"]
    h4 = jnp.maximum(dot(jnp.maximum(yz, 0.0).astype(bf16), p["w4"]) + p["b4"], 0.0)
    w = dot(h4.astype(bf16), p["w5"]) + p["b5"]
    return w, yz[:, :10], yz[:, 10:20]


if __name__ == "__main__":
    key = jax.random.PRNGKey(0)
    k_params, k_x = jax.random.split(key)
    params = init_params(k_params, nb_hidden1=256, nb_hidden4=100)

    B = 2
    x = jax.random.normal(k_x, (B, 2, 14, 14), dtype=jnp.float32)

    fwd = jax.jit(functools.partial(mlp_al_forward, p=params))
    w_out, y_out, z_out = fwd(x)
    jax.block_until_ready((w_out, y_out, z_out))

    assert w_out.shape == (B, 2)
    assert y_out.shape == (B, 10)
    assert z_out.shape == (B, 10)

    w_ref, y_ref, z_ref = mlp_al_reference(x, params)
    assert bool(jnp.all(jnp.isfinite(w_out)))
    assert bool(jnp.allclose(w_out, w_ref, atol=1e-2, rtol=1e-2))
    assert bool(jnp.allclose(y_out, y_ref, atol=1e-2, rtol=1e-2))
    assert bool(jnp.allclose(z_out, z_ref, atol=1e-2, rtol=1e-2))

    print("KERNEL_OK")
</pallas_src>

<mosaic_0001>
module attributes {stable_mosaic.version = 11 : i64} {
  func.func @_mlp_al_kernel(%arg0: i32, %arg1: memref<2x196xbf16, #tpu.memory_space<vmem>>, %arg2: memref<2x196xbf16, #tpu.memory_space<vmem>>, %arg3: memref<2x196x256xbf16, #tpu.memory_space<vmem>>, %arg4: memref<2x1x256xf32, #tpu.memory_space<vmem>>, %arg5: memref<2x256x128xbf16, #tpu.memory_space<vmem>>, %arg6: memref<2x1x128xf32, #tpu.memory_space<vmem>>, %arg7: memref<256x20xbf16, #tpu.memory_space<vmem>>, %arg8: memref<1x20xf32, #tpu.memory_space<vmem>>, %arg9: memref<20x100xbf16, #tpu.memory_space<vmem>>, %arg10: memref<1x100xf32, #tpu.memory_space<vmem>>, %arg11: memref<100x2xbf16, #tpu.memory_space<vmem>>, %arg12: memref<1x2xf32, #tpu.memory_space<vmem>>, %arg13: memref<2x22xf32, #tpu.memory_space<vmem>>) attributes {dimension_semantics = [#tpu.dimension_semantics<parallel>], iteration_bounds = array<i64: 1>, scalar_prefetch = 0 : i64, scratch_operands = 0 : i64, tpu.core_type = #tpu.core_type<tc>, window_params = [{transform_indices = @transform_0, window_bounds = array<i64: 2, 196>}, {transform_indices = @transform_1, window_bounds = array<i64: 2, 196>}, {pipeline_mode = #tpu.pipeline_mode<synchronous>, transform_indices = @transform_2, window_bounds = array<i64: 2, 196, 256>}, {pipeline_mode = #tpu.pipeline_mode<synchronous>, transform_indices = @transform_3, window_bounds = array<i64: 2, 1, 256>}, {pipeline_mode = #tpu.pipeline_mode<synchronous>, transform_indices = @transform_4, window_bounds = array<i64: 2, 256, 128>}, {pipeline_mode = #tpu.pipeline_mode<synchronous>, transform_indices = @transform_5, window_bounds = array<i64: 2, 1, 128>}, {pipeline_mode = #tpu.pipeline_mode<synchronous>, transform_indices = @transform_6, window_bounds = array<i64: 256, 20>}, {pipeline_mode = #tpu.pipeline_mode<synchronous>, transform_indices = @transform_7, window_bounds = array<i64: 1, 20>}, {pipeline_mode = #tpu.pipeline_mode<synchronous>, transform_indices = @transform_8, window_bounds = array<i64: 20, 100>}, {pipeline_mode = #tpu.pipeline_mode<synchronous>, transform_indices = @transform_9, window_bounds = array<i64: 1, 100>}, {pipeline_mode = #tpu.pipeline_mode<synchronous>, transform_indices = @transform_10, window_bounds = array<i64: 100, 2>}, {pipeline_mode = #tpu.pipeline_mode<synchronous>, transform_indices = @transform_11, window_bounds = array<i64: 1, 2>}, {transform_indices = @transform_12, window_bounds = array<i64: 2, 22>}]} {
    %c0 = arith.constant 0 : index
    %c0_0 = arith.constant 0 : index
    %0 = vector.load %arg1[%c0, %c0_0] : memref<2x196xbf16, #tpu.memory_space<vmem>>, vector<2x196xbf16>
    %c0_1 = arith.constant 0 : index
    %c0_2 = arith.constant 0 : index
    %c0_3 = arith.constant 0 : index
    %1 = vector.load %arg3[%c0_1, %c0_2, %c0_3] : memref<2x196x256xbf16, #tpu.memory_space<vmem>>, vector<1x196x256xbf16>
    %2 = vector.shape_cast %1 : vector<1x196x256xbf16> to vector<196x256xbf16>
    %cst = arith.constant dense<0.000000e+00> : vector<2x256xf32>
    %3 = tpu.matmul %0, %2, %cst {dimension_numbers = #tpu.dot_dimension_numbers<[1], [0], [0], [1], [0, 0, 1, 1], [], []>} : vector<2x196xbf16>, vector<196x256xbf16>, vector<2x256xf32> -> vector<2x256xf32>
    %c0_4 = arith.constant 0 : index
    %c0_5 = arith.constant 0 : index
    %c0_6 = arith.constant 0 : index
    %4 = vector.load %arg4[%c0_4, %c0_5, %c0_6] : memref<2x1x256xf32, #tpu.memory_space<vmem>>, vector<1x1x256xf32>
    %5 = vector.shape_cast %4 : vector<1x1x256xf32> to vector<1x256xf32>
    %6 = vector.broadcast %5 : vector<1x256xf32> to vector<2x256xf32>
    %7 = arith.addf %3, %6 : vector<2x256xf32>
    %cst_7 = arith.constant 0.000000e+00 : f32
    %8 = vector.broadcast %cst_7 : f32 to vector<2x256xf32>
    %9 = arith.maximumf %7, %8 : vector<2x256xf32>
    %10 = arith.truncf %9 : vector<2x256xf32> to vector<2x256xbf16>
    %c0_8 = arith.constant 0 : index
    %c0_9 = arith.constant 0 : index
    %c0_10 = arith.constant 0 : index
    %11 = vector.load %arg5[%c0_8, %c0_9, %c0_10] : memref<2x256x128xbf16, #tpu.memory_space<vmem>>, vector<1x256x128xbf16>
    %12 = vector.shape_cast %11 : vector<1x256x128xbf16> to vector<256x128xbf16>
    %cst_11 = arith.constant dense<0.000000e+00> : vector<2x128xf32>
    %13 = tpu.matmul %10, %12, %cst_11 {dimension_numbers = #tpu.dot_dimension_numbers<[1], [0], [0], [1], [0, 0, 1, 1], [], []>} : vector<2x256xbf16>, vector<256x128xbf16>, vector<2x128xf32> -> vector<2x128xf32>
    %c0_12 = arith.constant 0 : index
    %c0_13 = arith.constant 0 : index
    %c0_14 = arith.constant 0 : index
    %14 = vector.load %arg6[%c0_12, %c0_13, %c0_14] : memref<2x1x128xf32, #tpu.memory_space<vmem>>, vector<1x1x128xf32>
    %15 = vector.shape_cast %14 : vector<1x1x128xf32> to vector<1x128xf32>
    %16 = vector.broadcast %15 : vector<1x128xf32> to vector<2x128xf32>
    %17 = arith.addf %13, %16 : vector<2x128xf32>
    %cst_15 = arith.constant 0.000000e+00 : f32
    %18 = vector.broadcast %cst_15 : f32 to vector<2x128xf32>
    %19 = arith.maximumf %17, %18 : vector<2x128xf32>
    %c0_16 = arith.constant 0 : index
    %c0_17 = arith.constant 0 : index
    %20 = vector.load %arg2[%c0_16, %c0_17] : memref<2x196xbf16, #tpu.memory_space<vmem>>, vector<2x196xbf16>
    %c1 = arith.constant 1 : index
    %c0_18 = arith.constant 0 : index
    %c0_19 = arith.constant 0 : index
    %21 = vector.load %arg3[%c1, %c0_18, %c0_19] : memref<2x196x256xbf16, #tpu.memory_space<vmem>>, vector<1x196x256xbf16>
    %22 = vector.shape_cast %21 : vector<1x196x256xbf16> to vector<196x256xbf16>
    %cst_20 = arith.constant dense<0.000000e+00> : vector<2x256xf32>
    %23 = tpu.matmul %20, %22, %cst_20 {dimension_numbers = #tpu.dot_dimension_numbers<[1], [0], [0], [1], [0, 0, 1, 1], [], []>} : vector<2x196xbf16>, vector<196x256xbf16>, vector<2x256xf32> -> vector<2x256xf32>
    %c1_21 = arith.constant 1 : index
    %c0_22 = arith.constant 0 : index
    %c0_23 = arith.constant 0 : index
    %24 = vector.load %arg4[%c1_21, %c0_22, %c0_23] : memref<2x1x256xf32, #tpu.memory_space<vmem>>, vector<1x1x256xf32>
    %25 = vector.shape_cast %24 : vector<1x1x256xf32> to vector<1x256xf32>
    %26 = vector.broadcast %25 : vector<1x256xf32> to vector<2x256xf32>
    %27 = arith.addf %23, %26 : vector<2x256xf32>
    %cst_24 = arith.constant 0.000000e+00 : f32
    %28 = vector.broadcast %cst_24 : f32 to vector<2x256xf32>
    %29 = arith.maximumf %27, %28 : vector<2x256xf32>
    %30 = arith.truncf %29 : vector<2x256xf32> to vector<2x256xbf16>
    %c1_25 = arith.constant 1 : index
    %c0_26 = arith.constant 0 : index
    %c0_27 = arith.constant 0 : index
    %31 = vector.load %arg5[%c1_25, %c0_26, %c0_27] : memref<2x256x128xbf16, #tpu.memory_space<vmem>>, vector<1x256x128xbf16>
    %32 = vector.shape_cast %31 : vector<1x256x128xbf16> to vector<256x128xbf16>
    %cst_28 = arith.constant dense<0.000000e+00> : vector<2x128xf32>
    %33 = tpu.matmul %30, %32, %cst_28 {dimension_numbers = #tpu.dot_dimension_numbers<[1], [0], [0], [1], [0, 0, 1, 1], [], []>} : vector<2x256xbf16>, vector<256x128xbf16>, vector<2x128xf32> -> vector<2x128xf32>
    %c1_29 = arith.constant 1 : index
    %c0_30 = arith.constant 0 : index
    %c0_31 = arith.constant 0 : index
    %34 = vector.load %arg6[%c1_29, %c0_30, %c0_31] : memref<2x1x128xf32, #tpu.memory_space<vmem>>, vector<1x1x128xf32>
    %35 = vector.shape_cast %34 : vector<1x1x128xf32> to vector<1x128xf32>
    %36 = vector.broadcast %35 : vector<1x128xf32> to vector<2x128xf32>
    %37 = arith.addf %33, %36 : vector<2x128xf32>
    %cst_32 = arith.constant 0.000000e+00 : f32
    %38 = vector.broadcast %cst_32 : f32 to vector<2x128xf32>
    %39 = arith.maximumf %37, %38 : vector<2x128xf32>
    %40 = tpu.concatenate %19, %39 in 1 : vector<2x128xf32>, vector<2x128xf32> -> vector<2x256xf32>
    %41 = arith.truncf %40 : vector<2x256xf32> to vector<2x256xbf16>
    %c0_33 = arith.constant 0 : index
    %c0_34 = arith.constant 0 : index
    %42 = vector.load %arg7[%c0_33, %c0_34] : memref<256x20xbf16, #tpu.memory_space<vmem>>, vector<256x20xbf16>
    %cst_35 = arith.constant dense<0.000000e+00> : vector<2x20xf32>
    %43 = tpu.matmul %41, %42, %cst_35 {dimension_numbers = #tpu.dot_dimension_numbers<[1], [0], [0], [1], [0, 0, 1, 1], [], []>} : vector<2x256xbf16>, vector<256x20xbf16>, vector<2x20xf32> -> vector<2x20xf32>
    %c0_36 = arith.constant 0 : index
    %c0_37 = arith.constant 0 : index
    %44 = vector.load %arg8[%c0_36, %c0_37] : memref<1x20xf32, #tpu.memory_space<vmem>>, vector<1x20xf32>
    %45 = vector.broadcast %44 : vector<1x20xf32> to vector<2x20xf32>
    %46 = arith.addf %43, %45 : vector<2x20xf32>
    %cst_38 = arith.constant 0.000000e+00 : f32
    %47 = vector.broadcast %cst_38 : f32 to vector<2x20xf32>
    %48 = arith.maximumf %46, %47 : vector<2x20xf32>
    %49 = arith.truncf %48 : vector<2x20xf32> to vector<2x20xbf16>
    %c0_39 = arith.constant 0 : index
    %c0_40 = arith.constant 0 : index
    %50 = vector.load %arg9[%c0_39, %c0_40] : memref<20x100xbf16, #tpu.memory_space<vmem>>, vector<20x100xbf16>
    %cst_41 = arith.constant dense<0.000000e+00> : vector<2x100xf32>
    %51 = tpu.matmul %49, %50, %cst_41 {dimension_numbers = #tpu.dot_dimension_numbers<[1], [0], [0], [1], [0, 0, 1, 1], [], []>} : vector<2x20xbf16>, vector<20x100xbf16>, vector<2x100xf32> -> vector<2x100xf32>
    %c0_42 = arith.constant 0 : index
    %c0_43 = arith.constant 0 : index
    %52 = vector.load %arg10[%c0_42, %c0_43] : memref<1x100xf32, #tpu.memory_space<vmem>>, vector<1x100xf32>
    %53 = vector.broadcast %52 : vector<1x100xf32> to vector<2x100xf32>
    %54 = arith.addf %51, %53 : vector<2x100xf32>
    %cst_44 = arith.constant 0.000000e+00 : f32
    %55 = vector.broadcast %cst_44 : f32 to vector<2x100xf32>
    %56 = arith.maximumf %54, %55 : vector<2x100xf32>
    %57 = arith.truncf %56 : vector<2x100xf32> to vector<2x100xbf16>
    %c0_45 = arith.constant 0 : index
    %c0_46 = arith.constant 0 : index
    %58 = vector.load %arg11[%c0_45, %c0_46] : memref<100x2xbf16, #tpu.memory_space<vmem>>, vector<100x2xbf16>
    %cst_47 = arith.constant dense<0.000000e+00> : vector<2x2xf32>
    %59 = tpu.matmul %57, %58, %cst_47 {dimension_numbers = #tpu.dot_dimension_numbers<[1], [0], [0], [1], [0, 0, 1, 1], [], []>} : vector<2x100xbf16>, vector<100x2xbf16>, vector<2x2xf32> -> vector<2x2xf32>
    %c0_48 = arith.constant 0 : index
    %c0_49 = arith.constant 0 : index
    %60 = vector.load %arg12[%c0_48, %c0_49] : memref<1x2xf32, #tpu.memory_space<vmem>>, vector<1x2xf32>
    %61 = vector.broadcast %60 : vector<1x2xf32> to vector<2x2xf32>
    %62 = arith.addf %59, %61 : vector<2x2xf32>
    %63 = tpu.concatenate %46, %62 in 1 : vector<2x20xf32>, vector<2x2xf32> -> vector<2x22xf32>
    %c0_50 = arith.constant 0 : index
    %c0_51 = arith.constant 0 : index
    %64 = vector.load %arg13[%c0_50, %c0_51] : memref<2x22xf32, #tpu.memory_space<vmem>>, vector<2x22xf32>
    tpu.vector_store %arg13[%c0_50, %c0_51], %63 {strides = array<i32>} : memref<2x22xf32, #tpu.memory_space<vmem>>, vector<2x22xf32>,
    return
  }
  func.func @transform_0(%arg0: i32) -> (i32, i32) {
    %c0_i32 = arith.constant 0 : i32
    %c0_i32_0 = arith.constant 0 : i32
    return %arg0, %c0_i32 : i32, i32
  }
  func.func @transform_1(%arg0: i32) -> (i32, i32) {
    %c0_i32 = arith.constant 0 : i32
    %c0_i32_0 = arith.constant 0 : i32
    return %arg0, %c0_i32 : i32, i32
  }
  func.func @transform_2(%arg0: i32) -> (i32, i32, i32) {
    %c0_i32 = arith.constant 0 : i32
    %c0_i32_0 = arith.constant 0 : i32
    %c0_i32_1 = arith.constant 0 : i32
    %c0_i32_2 = arith.constant 0 : i32
    return %c0_i32, %c0_i32_0, %c0_i32_1 : i32, i32, i32
  }
  func.func @transform_3(%arg0: i32) -> (i32, i32, i32) {
    %c0_i32 = arith.constant 0 : i32
    %c0_i32_0 = arith.constant 0 : i32
    %c0_i32_1 = arith.constant 0 : i32
    %c0_i32_2 = arith.constant 0 : i32
    return %c0_i32, %c0_i32_0, %c0_i32_1 : i32, i32, i32
  }
  func.func @transform_4(%arg0: i32) -> (i32, i32, i32) {
    %c0_i32 = arith.constant 0 : i32
    %c0_i32_0 = arith.constant 0 : i32
    %c0_i32_1 = arith.constant 0 : i32
    %c0_i32_2 = arith.constant 0 : i32
    return %c0_i32, %c0_i32_0, %c0_i32_1 : i32, i32, i32
  }
  func.func @transform_5(%arg0: i32) -> (i32, i32, i32) {
    %c0_i32 = arith.constant 0 : i32
    %c0_i32_0 = arith.constant 0 : i32
    %c0_i32_1 = arith.constant 0 : i32
    %c0_i32_2 = arith.constant 0 : i32
    return %c0_i32, %c0_i32_0, %c0_i32_1 : i32, i32, i32
  }
  func.func @transform_6(%arg0: i32) -> (i32, i32) {
    %c0_i32 = arith.constant 0 : i32
    %c0_i32_0 = arith.constant 0 : i32
    %c0_i32_1 = arith.constant 0 : i32
    return %c0_i32, %c0_i32_0 : i32, i32
  }
  func.func @transform_7(%arg0: i32) -> (i32, i32) {
    %c0_i32 = arith.constant 0 : i32
    %c0_i32_0 = arith.constant 0 : i32
    %c0_i32_1 = arith.constant 0 : i32
    return %c0_i32, %c0_i32_0 : i32, i32
  }
  func.func @transform_8(%arg0: i32) -> (i32, i32) {
    %c0_i32 = arith.constant 0 : i32
    %c0_i32_0 = arith.constant 0 : i32
    %c0_i32_1 = arith.constant 0 : i32
    return %c0_i32, %c0_i32_0 : i32, i32
  }
  func.func @transform_9(%arg0: i32) -> (i32, i32) {
    %c0_i32 = arith.constant 0 : i32
    %c0_i32_0 = arith.constant 0 : i32
    %c0_i32_1 = arith.constant 0 : i32
    return %c0_i32, %c0_i32_0 : i32, i32
  }
  func.func @transform_10(%arg0: i32) -> (i32, i32) {
    %c0_i32 = arith.constant 0 : i32
    %c0_i32_0 = arith.constant 0 : i32
    %c0_i32_1 = arith.constant 0 : i32
    return %c0_i32, %c0_i32_0 : i32, i32
  }
  func.func @transform_11(%arg0: i32) -> (i32, i32) {
    %c0_i32 = arith.constant 0 : i32
    %c0_i32_0 = arith.constant 0 : i32
    %c0_i32_1 = arith.constant 0 : i32
    return %c0_i32, %c0_i32_0 : i32, i32
  }
  func.func @transform_12(%arg0: i32) -> (i32, i32) {
    %c0_i32 = arith.constant 0 : i32
    %c0_i32_0 = arith.constant 0 : i32
    return %arg0, %c0_i32 : i32, i32
  }
}

</mosaic_0001>

<bundles_post_ra>
// kernel: mlp_al_forward.1
= control target key start
LH: loop header
LB: loop body
LE: loop exit
PB: predicated region body
PF: predicated region fallthrough
CT: control target
= control target key end

     0   :  { %17 = vsyncpa [#allocation3], 0  ;;  %s1917_s0 = inlined_call_operand.vmem [shape: bf16[2,196], index: 0, kind: input, shape index: {}]   ;;  %s1918_s1 = inlined_call_operand.vmem [shape: bf16[2,196], index: 1, kind: input, shape index: {}]   ;;  %s1919_s2 = inlined_call_operand.hbm [shape: bf16[2,196,256], index: 2, kind: input, shape index: {}]   ;;  %s1920_s3 = inlined_call_operand.vmem [shape: f32[2,1,256], index: 3, kind: input, shape index: {}]   ;;  %s1921_s4 = inlined_call_operand.hbm [shape: bf16[2,256,128], index: 4, kind: input, shape index: {}]   ;;  %s1922_s5 = inlined_call_operand.vmem [shape: f32[2,1,128], index: 5, kind: input, shape index: {}]   ;;  %s1923_s6 = inlined_call_operand.vmem [shape: bf16[256,20], index: 6, kind: input, shape index: {}]   ;;  %s1924_s7 = inlined_call_operand.vmem [shape: f32[1,20], index: 7, kind: input, shape index: {}]   ;;  %s1925_s8 = inlined_call_operand.vmem [shape: bf16[20,100], index: 8, kind: input, shape index: {}]   ;;  %s1926_s9 = inlined_call_operand.vmem [shape: f32[1,100], index: 9, kind: input, shape index: {}]   ;;  %s1927_s10 = inlined_call_operand.vmem [shape: bf16[100,2], index: 10, kind: input, shape index: {}]   ;;  %s1928_s11 = inlined_call_operand.vmem [shape: f32[1,2], index: 11, kind: input, shape index: {}]   ;;  %s1929_s12 = inlined_call_operand.vmem [shape: f32[2,22], index: 12, kind: output, shape index: {}]  }
   0x1   :  { %18 = vsyncpa [#allocation5], 0  ;;  %s1690_s21 = smov [#allocation2]  }
   0x2   :  { %s28_s22 = sshll.u32 %s1690_s21, 4  ;;  %s29_s22 = int_to_ptr.vmem [resolvable:$true] %s28_s22 }
   0x3   :  { %s1654_s23 = scalar_lea.vmem %s29_s22, 6400  ;;  %p1659_p1 = scmp.lt.s32.totalorder %s29_s22, %s29_s22 }
   0x4   :  { %p1655_p0 = scmp.ne.s32.totalorder %s29_s22, %s1654_s23  ;;  %p1660_p2 = scmp.lt.s32.totalorder %s1654_s23, %s1654_s23 }
   0x6   :  { %p1661_p3 = por %p1660_p2, %p1659_p1 }
   0x8   :  { %p1662_p4 = pnand %p1661_p3, %p1655_p0 }
   0xa   :  { %1665 = shalt.err (!%p1662_p4)
}
   0xb   :  { %s1691_s24 = smov 128   ;;  %s1692_s25 = smov 8  }
   0xc   :  { %34 = dma.hbm_to_vmem [thread:$0]  %s1919_s2, 6400, %s29_s22, [#allocation3], %s1691_s24, %s1691_s24, %s1692_s25  }
   0xd   :  { %s1693_s28 = smov [#allocation4]  }
   0xe   :  { %s42_s29 = sshll.u32 %s1693_s28, 4  ;;  %s43_s29 = int_to_ptr.vmem [resolvable:$true] %s42_s29 }
   0xf   :  { %s1674_s30 = scalar_lea.vmem %s43_s29, 4096  ;;  %p1679_p6 = scmp.lt.s32.totalorder %s43_s29, %s43_s29 }
  0x10   :  { %p1675_p5 = scmp.ne.s32.totalorder %s43_s29, %s1674_s30  ;;  %p1680_p7 = scmp.lt.s32.totalorder %s1674_s30, %s1674_s30 }
  0x12   :  { %p1681_p8 = por %p1680_p7, %p1679_p6 }
  0x14   :  { %p1682_p9 = pnand %p1681_p8, %p1675_p5 }
  0x16   :  { %1685 = shalt.err (!%p1682_p9)
}
  0x17   :  { %s1694_s13 = smov 64   ;;  %s1695_s14 = smov 4  }
  0x18   :  { %48 = dma.hbm_to_vmem [thread:$0]  %s1921_s4, 4096, %s43_s29, [#allocation5], %s1694_s13, %s1694_s13, %s1695_s14  }
  0x19   :  { %1686 = dma.done.wait [#allocation3], 6400  }
  0x1a   :  { %1687 = vsyncadd [#allocation3], 4294960896 }
  0x1b   :  { %1688 = dma.done.wait [#allocation5], 4096  }
  0x1c   :  { %1689 = vsyncadd [#allocation5], 4294963200  ;;  %v1513_v0 = vld [vmem:[#allocation2 + $0x74] ss:$8 sps:$4 sm:$0xff]   ;;  %v1515_v1 = vld [vmem:[#allocation2 + $0x70] ss:$8 sps:$4 sm:$0xff]   ;;  %v98_v6 = vlaneseq }
  0x1d   :  { %268 = vmatprep.subr.bf16.mxu0 %v1513_v0  ;;  %v1516_v2 = vld [vmem:[#allocation2 + $0x64] ss:$8 sps:$4 sm:$0xff]   ;;  %v1518_v3 = vld [vmem:[#allocation2 + $0x60] ss:$8 sps:$4 sm:$0xff]   ;;  %v1519_v4 = vld [vmem:[#allocation2 + $0x54] ss:$8 sps:$4 sm:$0xff]  }
  0x1e   :  { %269 = vmatpush1.bf16.msra.mxu0 %v1515_v1  ;;  %v1521_v5 = vld [vmem:[#allocation2 + $0x50] ss:$8 sps:$4 sm:$0xff]   ;;  %v1696_v7 = vmov 1966171168   ;;  %v1522_v9 = vld [vmem:[#allocation2 + $0x44] ss:$8 sps:$4 sm:$0xff]  }
  0x1f   :  { %270 = vmatprep.subr.bf16.mxu0 %v1516_v2  ;;  %v118_v8 = vunpack.c.l.s4 %v1696_v7  ;;  %v1524_v10 = vld [vmem:[#allocation2 + $0x40] ss:$8 sps:$4 sm:$0xff]   ;;  %v1771_v11 = vshrl.u32 %v98_v6, 7  ;;  %v1525_v13 = vld [vmem:[#allocation2 + $0x34] ss:$8 sps:$4 sm:$0xff]   ;;  %vm257_vm0 = vcmask 556032  }
  0x20   :  { %v1527_v14 = vld [vmem:[#allocation2 + $0x30] ss:$8 sps:$4 sm:$0xff]   ;;  %v1528_v16 = vld [vmem:[#allocation2 + $0x24] ss:$8 sps:$4 sm:$0xff]   ;;  %v1530_v18 = vld [vmem:[#allocation2 + $0x20] ss:$8 sps:$4 sm:$0xff]  }
  0x21   :  { %v119_v12 = vunpack.c.0.s8 %v118_v8  ;;  %v1779_v17 = vld.sshfl [vmem:[%s1917_s0] sm:$0x11 pattern:$0x75316420]  ;;  %v1551_v20 = vld [vmem:[#allocation4 + $0x78] sm:$0xff]   ;;  %v1555_v27 = vld [vmem:[#allocation4 + $0x68] sm:$0xff]  }
  0x22   :  { %271 = vmatpush1.bf16.msra.mxu0 %v1518_v3  ;;  %v116_v19 = vcombine.high %v1779_v17, %v1779_v17  ;;  %v1531_v21 = vld [vmem:[#allocation2 + $0x14] ss:$8 sps:$4 sm:$0xff]   ;;  %v1552_v22 = vld [vmem:[#allocation4 + $0x38] sm:$0xff]   ;;  %1400 = vmatprep.subr.bf16.mxu1 %v1551_v20  ;;  %v1553_v24 = vld [vmem:[#allocation4 + $0x70] sm:$0xff]   ;;  %vm261_vm1 = vcmask 1041408   ;;  %v100_v55 = vsub.s32 0, %v1771_v11 }
  0x23   :  { %272 = vmatprep.subr.bf16.mxu0 %v1519_v4  ;;  %v1774_v15 = vsub.s32 %v119_v12, %v1771_v11  ;;  %1401 = vmatpush3.bf16.msra.mxu1 %v1552_v22  ;;  %v1554_v25 = vld [vmem:[#allocation4 + $0x30] sm:$0xff]   ;;  %v1533_v26 = vld [vmem:[#allocation2 + $0x10] ss:$8 sps:$4 sm:$0xff]   ;;  %v1559_v36 = vld [vmem:[#allocation4 + $0x58] sm:$0xff]   ;;  %v104_v57 = vsub.s32 1, %v1771_v11  ;;  %vm1698_vm2 = vmmov 0  }
  0x24   :  { %1402 = vmatprep.subr.bf16.mxu1 %v1553_v24  ;;  %v1534_v28 = vld [vmem:[#allocation2 + $0x4] ss:$8 sps:$4 sm:$0xff]   ;;  %v1556_v30 = vld [vmem:[#allocation4 + $0x28] sm:$0xff]   ;;  %v1557_v31 = vld [vmem:[#allocation4 + $0x60] sm:$0xff]   ;;  %vm1108_vm3 = vcmask 162816   ;;  %vm1216_vm4 = vcmask 818176  }
  0x25   :  { %v130_v23 = vrot.slane %v116_v19, %v1774_v15  ;;  %v95_v29 = vld [vmem:[#allocation2 + $0xc0] sm:$0x33]  ;;  %v1558_v35 = vld [vmem:[#allocation4 + $0x20] sm:$0xff]   ;;  %v1560_v38 = vld [vmem:[#allocation4 + $0x18] sm:$0xff]   ;;  %v123_v49 = vrot.slane %v1779_v17, %v1774_v15  ;;  %vm1268_vm5 = vcmask 173056  }
  0x26   :  { %273 = vmatpush1.bf16.msra.mxu0 %v1521_v5  ;;  %v1536_v32 = vld [vmem:[#allocation2] ss:$8 sps:$4 sm:$0xff]   ;;  %v1302_v33 = vcombine.high %v95_v29, %v95_v29  ;;  %v1301_v34 = vcombine.low %v95_v29, %v95_v29  ;;  %v1539_v37 = vld [vmem:[#allocation2 + $0xb4] ss:$8 sps:$4 sm:$0xff]   ;;  %v1541_v41 = vld [vmem:[#allocation2 + $0xb0] ss:$8 sps:$4 sm:$0xff]  }
  0x27   :  { %274 = vmatprep.subr.bf16.mxu0 %v1522_v9  ;;  %1304 = vmatprep.mubr.msk.bf16.mxu0 %vm257_vm0, %v130_v23  ;;  %v1561_v39 = vld [vmem:[#allocation4 + $0x50] sm:$0xff]   ;;  %v1545_v45 = vld [vmem:[#allocation2 + $0x94] ss:$8 sps:$4 sm:$0xff]   ;;  %v1547_v46 = vld [vmem:[#allocation2 + $0x90] ss:$8 sps:$4 sm:$0xff]  }
  0x28   :  { %1403 = vmatpush3.bf16.msra.mxu1 %v1554_v25  ;;  %v263_v40 = vsel %vm261_vm1, %v1301_v34, 0  ;;  %v1542_v42 = vld [vmem:[#allocation2 + $0xa4] ss:$8 sps:$4 sm:$0xff]   ;;  %v1544_v44 = vld [vmem:[#allocation2 + $0xa0] ss:$8 sps:$4 sm:$0xff]   ;;  %v1563_v50 = vld [vmem:[#allocation4 + $0x48] sm:$0xff]  }
  0x29   :  { %1404 = vmatprep.subr.bf16.mxu1 %v1555_v27  ;;  %v1562_v43 = vld [vmem:[#allocation4 + $0x10] sm:$0xff]   ;;  %v1564_v51 = vld [vmem:[#allocation4 + $0x8] sm:$0xff]   ;;  %v1565_v52 = vld [vmem:[#allocation4 + $0x40] sm:$0xff]  }
  0x2a   :  { %275 = vmatpush1.bf16.msra.mxu0 %v1524_v10  ;;  %v1548_v47 = vld [vmem:[#allocation2 + $0x84] ss:$8 sps:$4 sm:$0xff]   ;;  %v1550_v48 = vld [vmem:[#allocation2 + $0x80] ss:$8 sps:$4 sm:$0xff]   ;;  %v1566_v53 = vld [vmem:[#allocation4] sm:$0xff]  }
  0x2b   :  { %276 = vmatprep.subr.bf16.mxu0 %v1525_v13  ;;  %v1569_v54 = vld [vmem:[#allocation2 + $0x13c] ss:$8 sps:$4 sm:$0xff]   ;;  %v96_v56 = vld [vmem:[%s1920_s3] sm:$0x3]  ;;  %v1572_v10 = vld [vmem:[#allocation2 + $0x12c] ss:$8 sps:$4 sm:$0xff]  }
  0x2c   :  { %1405 = vmatpush3.bf16.msra.mxu1 %v1556_v30  ;;  %v101_v58 = vrot.slane %v96_v56, %v100_v55  ;;  %v105_v59 = vrot.slane %v96_v56, %v104_v57  ;;  %v1801_v61 = vld.sshfl [vmem:[%s1918_s1] sm:$0x11 pattern:$0x75316420]  ;;  %v1570_v12 = vld [vmem:[#allocation2 + $0x128] ss:$8 sps:$4 sm:$0xff]  }
  0x2d   :  { %1406 = vmatprep.subr.bf16.mxu1 %v1557_v31  ;;  %v537_v1 = vcombine.high %v1801_v61, %v1801_v61  ;;  %v1567_v7 = vld [vmem:[#allocation2 + $0x138] ss:$8 sps:$4 sm:$0xff]   ;;  %v1575_v13 = vld [vmem:[#allocation2 + $0x11c] ss:$8 sps:$4 sm:$0xff]   ;;  %v1576_v17 = vld [vmem:[#allocation2 + $0x108] ss:$8 sps:$4 sm:$0xff]  }
  0x2e   :  { %277 = vmatpush1.bf16.msra.mxu0 %v1527_v14  ;;  %v1573_v14 = vld [vmem:[#allocation2 + $0x118] ss:$8 sps:$4 sm:$0xff]   ;;  %v1584_v20 = vld [vmem:[#allocation2 + $0xec] ss:$8 sps:$4 sm:$0xff]   ;;  %v1587_v22 = vld [vmem:[#allocation2 + $0xdc] ss:$8 sps:$4 sm:$0xff]  }
  0x2f   :  { %278 = vmatprep.subr.bf16.mxu0 %v1528_v16  ;;  %v551_v8 = vrot.slane %v537_v1, %v1774_v15  ;;  %v1578_v16 = vld [vmem:[#allocation2 + $0x10c] ss:$8 sps:$4 sm:$0xff]   ;;  %v1579_v19 = vld [vmem:[#allocation2 + $0xf8] ss:$8 sps:$4 sm:$0xff]   ;;  %v1595_v30 = vld [vmem:[#allocation2 + $0x17c] ss:$8 sps:$4 sm:$0xff]  }
  0x30   :  { %1407 = vmatpush3.bf16.msra.mxu1 %v1558_v35  ;;  %v1585_v23 = vld [vmem:[#allocation2 + $0xd8] ss:$8 sps:$4 sm:$0xff]   ;;  %v1590_v24 = vld [vmem:[#allocation2 + $0xcc] ss:$8 sps:$4 sm:$0xff]   ;;  %v1601_v34 = vld [vmem:[#allocation2 + $0x15c] ss:$8 sps:$4 sm:$0xff]  }
  0x31   :  { %1408 = vmatprep.subr.bf16.mxu1 %v1559_v36  ;;  %v515_v25 = vld [vmem:[#allocation2 + $0x188] sm:$0x33]  ;;  %v1593_v31 = vld [vmem:[#allocation2 + $0x178] ss:$8 sps:$4 sm:$0xff]   ;;  %v1624_v11 = vld [vmem:[%s1923_s6 + $0x30] sm:$0xff]  }
  0x32   :  { %279 = vmatpush1.bf16.msra.mxu0 %v1530_v18  ;;  %v1581_v18 = vld [vmem:[#allocation2 + $0xfc] ss:$8 sps:$4 sm:$0xff]   ;;  %v1349_v27 = vcombine.high %v515_v25, %v515_v25  ;;  %v1599_v35 = vld [vmem:[#allocation2 + $0x158] ss:$8 sps:$4 sm:$0xff]   ;;  %v1604_v36 = vld [vmem:[#allocation2 + $0x14c] ss:$8 sps:$4 sm:$0xff]  }
  0x33   :  { %280 = vmatprep.subr.bf16.mxu0 %v1531_v21  ;;  %v1582_v21 = vld [vmem:[#allocation2 + $0xe8] ss:$8 sps:$4 sm:$0xff]  }
  0x34   :  { %1409 = vmatpush3.bf16.msra.mxu1 %v1560_v38  ;;  %v544_v38 = vrot.slane %v1801_v61, %v1774_v15  ;;  %v1614_v15 = vld [vmem:[#allocation4 + $0x98] sm:$0xff]  }
  0x35   :  { %1410 = vmatprep.subr.bf16.mxu1 %v1561_v39  ;;  %v1605_v39 = vld [vmem:[#allocation4 + $0xf8] sm:$0xff]  }
  0x36   :  { %281 = vmatpush1.bf16.msra.mxu0 %v1533_v26  ;;  %v1588_v26 = vld [vmem:[#allocation2 + $0xc8] ss:$8 sps:$4 sm:$0xff]  }
  0x37   :  { %282 = vmatprep.subr.bf16.mxu0 %v1534_v28  ;;  %v1348_v28 = vcombine.low %v515_v25, %v515_v25  ;;  %v1305_v25 = vld [vmem:[%s1922_s5] ss:$0 sm:$0xff] }
  0x38   :  { %1411 = vmatpush3.bf16.msra.mxu1 %v1562_v43  ;;  %v1609_v43 = vld [vmem:[#allocation4 + $0xe8] sm:$0xff]  }
  0x39   :  { %1412 = vmatprep.subr.bf16.mxu1 %v1563_v50  ;;  %v682_v29 = vsel %vm261_vm1, %v1348_v28, 0  ;;  %v1617_v50 = vld [vmem:[#allocation4 + $0xc8] sm:$0xff]   ;;  %v1353_v28 = vld [vmem:[%s1922_s5 + $0x1] ss:$0 sm:$0xff] }
  0x3a   :  { %283 = vmatpush1.bf16.msra.mxu0 %v1536_v32  ;;  %v1598_v32 = vld [vmem:[#allocation2 + $0x16c] ss:$8 sps:$4 sm:$0xff]  }
  0x3b   :  { %1303 = vmatprep.subr.msk.bf16.mxu0 %vm261_vm1, %v1302_v33  ;;  %v1596_v33 = vld [vmem:[#allocation2 + $0x168] ss:$8 sps:$4 sm:$0xff]  }
  0x3c   :  { %1413 = vmatpush3.bf16.msra.mxu1 %v1564_v51  ;;  %v1618_v51 = vld [vmem:[#allocation4 + $0x88] sm:$0xff]  }
  0x3d   :  { %1414 = vmatprep.subr.bf16.mxu1 %v1565_v52  ;;  %v1619_v52 = vld [vmem:[#allocation4 + $0xc0] sm:$0xff]  }
  0x3e   :  { %291 = vmatpush2.bf16.msra.mxu0 %v263_v40  ;;  %v1606_v40 = vld [vmem:[#allocation4 + $0xb8] sm:$0xff]  }
  0x3f   :  { %292 = vmatprep.subr.bf16.mxu0 %v1539_v37  ;;  %v1602_v37 = vld [vmem:[#allocation2 + $0x148] ss:$8 sps:$4 sm:$0xff]  }
  0x40   :  { %1415 = vmatpush3.bf16.msra.mxu1 %v1566_v53  ;;  %v1620_v53 = vld [vmem:[#allocation4 + $0x80] sm:$0xff]  }
  0x41   :  { %687 = vmatprep.subr.bf16.mxu1 %v1569_v54  ;;  %v1621_v54 = vld [vmem:[%s1923_s6 + $0x78] sm:$0xff]  }
  0x42   :  { %293 = vmatpush2.bf16.msra.mxu0 %v1541_v41  ;;  %v1607_v41 = vld [vmem:[#allocation4 + $0xf0] sm:$0xff]  }
  0x43   :  { %294 = vmatprep.subr.bf16.mxu0 %v1542_v42  ;;  %v1608_v42 = vld [vmem:[#allocation4 + $0xb0] sm:$0xff]  }
  0x46   :  { %295 = vmatpush2.bf16.msra.mxu0 %v1544_v44  ;;  %v1610_v44 = vld [vmem:[#allocation4 + $0xa8] sm:$0xff]  }
  0x47   :  { %296 = vmatprep.subr.bf16.mxu0 %v1545_v45  ;;  %v1611_v45 = vld [vmem:[#allocation4 + $0xe0] sm:$0xff]  }
  0x4a   :  { %297 = vmatpush2.bf16.msra.mxu0 %v1547_v46  ;;  %v1612_v46 = vld [vmem:[#allocation4 + $0xa0] sm:$0xff]  }
  0x4b   :  { %298 = vmatprep.subr.bf16.mxu0 %v1548_v47  ;;  %v1613_v47 = vld [vmem:[#allocation4 + $0xd8] sm:$0xff]  }
  0x4e   :  { %299 = vmatpush2.bf16.msra.mxu0 %v1550_v48  ;;  %v1615_v48 = vld [vmem:[#allocation4 + $0xd0] sm:$0xff]  }
  0x4f   :  { %1422 = vmatprep.subr.bf16.mxu0 %v1605_v39  ;;  %v1697_v39 = vmov 0.0  }
  0x51   :  { %301 = vmatmul.mubr.bf16.vlgmr.msra.gmra.mxu0 %v123_v49  ;;  %v1616_v49 = vld [vmem:[#allocation4 + $0x90] sm:$0xff]  }
  0x52   :  { %1423 = vmatpush3.bf16.msra.mxu0 %v1606_v40 }
  0x53   :  { %1424 = vmatprep.subr.bf16.mxu0 %v1607_v41  ;;  %v1638_v41 = vld [vmem:[%s1925_s8] sm:$0xff]  }
  0x56   :  { %1425 = vmatpush3.bf16.msra.mxu0 %v1608_v42 }
  0x57   :  { %1426 = vmatprep.subr.bf16.mxu0 %v1609_v43  ;;  %v1370_v43 = vld [vmem:[%s1924_s7] ss:$0 sm:$0xff] }
  0x5a   :  { %1427 = vmatpush3.bf16.msra.mxu0 %v1610_v44 }
  0x5b   :  { %1428 = vmatprep.subr.bf16.mxu0 %v1611_v45 }
  0x5e   :  { %1429 = vmatpush3.bf16.msra.mxu0 %v1612_v46 }
  0x5f   :  { %1430 = vmatprep.subr.bf16.mxu0 %v1613_v47 }
  0x62   :  { %1431 = vmatpush3.bf16.msra.mxu0 %v1614_v15  ;;  %v1639_v15 = vld [vmem:[%s1927_s10 + $0x30] ss:$0 sps:$4 sm:$0x33]  }
  0x63   :  { %1432 = vmatprep.subr.bf16.mxu0 %v1615_v48 }
  0x66   :  { %1433 = vmatpush3.bf16.msra.mxu0 %v1616_v49 }
  0x67   :  { %1434 = vmatprep.subr.bf16.mxu0 %v1617_v50 }
  0x6a   :  { %1435 = vmatpush3.bf16.msra.mxu0 %v1618_v51  ;;  %v1221_v51 = vsel %vm261_vm1, %v1639_v15, 0 }
  0x6b   :  { %1436 = vmatprep.subr.bf16.mxu0 %v1619_v52  ;;  %v1640_v52 = vld [vmem:[%s1927_s10 + $0x28] sm:$0xff]  }
  0x6e   :  { %1437 = vmatpush3.bf16.msra.mxu0 %v1620_v53  ;;  %v1641_v53 = vld [vmem:[%s1927_s10 + $0x20] sm:$0xff]  }
  0x6f   :  { %1444 = vmatprep.subr.bf16.mxu0 %v1621_v54  ;;  %v1642_v54 = vld [vmem:[%s1927_s10 + $0x18] sm:$0xff]  }
 0x111   :  { %v302_v60 = vpop.f32.mrf.mxu0 }
 0x112   :  { %v303_v62 = vadd.f32 %v302_v60, %v101_v58 }
 0x113   :  { %v304_v63 = vpop.f32.mrf.mxu0 }
 0x114   :  { %v305_v0 = vadd.f32 %v304_v63, %v105_v59  ;;  %v309_v2 = vmax.f32 %v303_v62, 0.0  ;;  %v1322_v62 = vld [vmem:[%s1920_s3 + $0x2] sm:$0x3] }
 0x115   :  { %v306_v3 = vpop.f32.mrf.mxu0  ;;  %v522_v63 = vrot.slane %v1322_v62, %v100_v55  ;;  %v1623_v55 = vld [vmem:[%s1923_s6 + $0x70] sm:$0xff]  }
 0x116   :  { %v310_v4 = vmax.f32 %v305_v0, 0.0  ;;  %v311_v9 = vpack.c.bf16 %v309_v2, %v309_v2  ;;  %v526_v0 = vrot.slane %v1322_v62, %v104_v57  ;;  %v1625_v57 = vld [vmem:[%s1923_s6 + $0x68] sm:$0xff]  }
 0x117   :  { %v307_v5 = vpop.f32.mrf.mxu0 }
 0x118   :  { %v312_v6 = vpack.c.bf16 %v310_v4, %v310_v4 }
 0x11a   :  { %480 = vmatprep.mubr.bf16.mxu1 %v312_v6 }
 0x11b   :  { %481 = vmatmul.mubr.bf16.vlgmr.msra.gmra.mxu1 %v311_v9 }
 0x11c   :  { %688 = vmatpush1.bf16.msra.mxu1 %v1567_v7  ;;  %1351 = vmatprep.mubr.msk.bf16.mxu1 %vm257_vm0, %v551_v8 }
 0x11d   :  { %689 = vmatprep.subr.bf16.mxu1 %v1572_v10  ;;  %v1622_v10 = vld [vmem:[%s1923_s6 + $0x38] sm:$0xff]  }
 0x120   :  { %690 = vmatpush1.bf16.msra.mxu1 %v1570_v12 }
 0x121   :  { %691 = vmatprep.subr.bf16.mxu1 %v1575_v13  ;;  %v1626_v13 = vld [vmem:[%s1923_s6 + $0x28] sm:$0xff]  }
 0x124   :  { %692 = vmatpush1.bf16.msra.mxu1 %v1573_v14  ;;  %v1627_v14 = vld [vmem:[%s1923_s6 + $0x60] sm:$0xff]  }
 0x125   :  { %693 = vmatprep.subr.bf16.mxu1 %v1578_v16  ;;  %v1628_v16 = vld [vmem:[%s1923_s6 + $0x20] sm:$0xff]  }
 0x128   :  { %694 = vmatpush1.bf16.msra.mxu1 %v1576_v17  ;;  %v1629_v17 = vld [vmem:[%s1923_s6 + $0x58] sm:$0xff]  }
 0x129   :  { %695 = vmatprep.subr.bf16.mxu1 %v1581_v18  ;;  %v1630_v18 = vld [vmem:[%s1923_s6 + $0x18] sm:$0xff]  }
 0x12c   :  { %696 = vmatpush1.bf16.msra.mxu1 %v1579_v19  ;;  %v1631_v19 = vld [vmem:[%s1923_s6 + $0x50] sm:$0xff]  }
 0x12d   :  { %697 = vmatprep.subr.bf16.mxu1 %v1584_v20  ;;  %v1632_v20 = vld [vmem:[%s1923_s6 + $0x10] sm:$0xff]  }
 0x130   :  { %698 = vmatpush1.bf16.msra.mxu1 %v1582_v21  ;;  %v1633_v21 = vld [vmem:[%s1923_s6 + $0x48] sm:$0xff]  }
 0x131   :  { %699 = vmatprep.subr.bf16.mxu1 %v1587_v22  ;;  %v1634_v22 = vld [vmem:[%s1923_s6 + $0x8] sm:$0xff]  }
 0x134   :  { %700 = vmatpush1.bf16.msra.mxu1 %v1585_v23  ;;  %v1635_v23 = vld [vmem:[%s1923_s6 + $0x40] sm:$0xff]  }
 0x135   :  { %701 = vmatprep.subr.bf16.mxu1 %v1590_v24  ;;  %v1636_v24 = vld [vmem:[%s1923_s6] sm:$0xff]  }
 0x138   :  { %702 = vmatpush1.bf16.msra.mxu1 %v1588_v26 }
 0x139   :  { %1350 = vmatprep.subr.msk.bf16.mxu1 %vm261_vm1, %v1349_v27 }
 0x13c   :  { %710 = vmatpush2.bf16.msra.mxu1 %v682_v29 }
 0x13d   :  { %711 = vmatprep.subr.bf16.mxu1 %v1595_v30 }
 0x140   :  { %712 = vmatpush2.bf16.msra.mxu1 %v1593_v31 }
 0x141   :  { %713 = vmatprep.subr.bf16.mxu1 %v1598_v32 }
 0x144   :  { %714 = vmatpush2.bf16.msra.mxu1 %v1596_v33 }
 0x145   :  { %715 = vmatprep.subr.bf16.mxu1 %v1601_v34 }
 0x148   :  { %716 = vmatpush2.bf16.msra.mxu1 %v1599_v35 }
 0x149   :  { %717 = vmatprep.subr.bf16.mxu1 %v1604_v36 }
 0x14c   :  { %718 = vmatpush2.bf16.msra.mxu1 %v1602_v37 }
 0x14d   :  { %1477 = vmatprep.subr.bf16.mxu1 %v1697_v39 }
 0x14f   :  { %720 = vmatmul.mubr.bf16.vlgmr.msra.gmra.mxu1 %v544_v38  ;;  %v1637_v38 = vld [vmem:[%s1925_s8 + $0x8] ss:$0 sps:$4 sm:$0x33]  }
 0x150   :  { %v1113_v40 = vsel %vm261_vm1, %v1637_v38, 0  ;;  %1481 = vmatprep.mubr.msk.bf16.mxu1 %vm1698_vm2, %v1697_v39 }
 0x151   :  { %1478 = vmatpush3.bf16.msra.mxu1 %v1113_v40 }
 0x152   :  { %1479 = vmatprep.subr.bf16.mxu1 %v1697_v39 }
 0x155   :  { %1480 = vmatpush3.bf16.msra.mxu1 %v1638_v41 }
 0x156   :  { %1485 = vmatprep.subr.bf16.mxu1 %v1697_v39 }
 0x1db   :  { %v1416_v56 = vpop.f32.mrf.mxu1 }
 0x1dd   :  { %v1417_v58 = vpop.f32.mrf.mxu1 }
 0x1de   :  { %v1418_v59 = vadd.f32 %v1417_v58, %v1416_v56  ;;  %v1643_v56 = vld [vmem:[%s1927_s10 + $0x10] sm:$0xff]   ;;  %v1644_v58 = vld [vmem:[%s1927_s10 + $0x8] sm:$0xff]  }
 0x1df   :  { %v1419_v60 = vpop.f32.mrf.mxu1 }
 0x1e0   :  { %v483_v27 = vadd.f32 %v1418_v59, %v1305_v25  ;;  %v1645_v59 = vld [vmem:[%s1927_s10] sm:$0xff]   ;;  %s1699_s10 = smov 20  }
 0x1e1   :  { %v1420_v61 = vpop.f32.mrf.mxu1  ;;  %v1387_v60 = vld [vmem:[%s1926_s9] ss:$0 sm:$0xff] }
 0x1e2   :  { %v488_v33 = vmax.f32 %v483_v27, 0.0 }
 0x1e4   :  { %v910_v37 = vpack.c.bf16 %v488_v33, %v488_v33 }
 0x20f   :  { %v721_v1 = vpop.f32.mrf.mxu1 }
 0x210   :  { %v722_v2 = vadd.f32 %v721_v1, %v522_v63 }
 0x211   :  { %v723_v3 = vpop.f32.mrf.mxu1 }
 0x212   :  { %v724_v4 = vadd.f32 %v723_v3, %v526_v0  ;;  %v728_v5 = vmax.f32 %v722_v2, 0.0 }
 0x213   :  { %v725_v6 = vpop.f32.mrf.mxu1 }
 0x214   :  { %v729_v7 = vmax.f32 %v724_v4, 0.0  ;;  %v730_v12 = vpack.c.bf16 %v728_v5, %v728_v5  ;;  %v1391_v4 = vld [vmem:[%s1928_s11] ss:$0 sm:$0xff] }
 0x215   :  { %v726_v8 = vpop.f32.mrf.mxu1 }
 0x216   :  { %v731_v9 = vpack.c.bf16 %v729_v7, %v729_v7 }
 0x218   :  { %901 = vmatprep.mubr.bf16.mxu0 %v731_v9 }
 0x219   :  { %902 = vmatmul.mubr.bf16.vlgmr.msra.gmra.mxu0 %v730_v12 }
 0x21a   :  { %1445 = vmatpush3.bf16.msra.mxu0 %v1622_v10 }
 0x21b   :  { %1446 = vmatprep.subr.bf16.mxu0 %v1623_v55 }
 0x21e   :  { %1447 = vmatpush3.bf16.msra.mxu0 %v1624_v11 }
 0x21f   :  { %1448 = vmatprep.subr.bf16.mxu0 %v1625_v57 }
 0x222   :  { %1449 = vmatpush3.bf16.msra.mxu0 %v1626_v13 }
 0x223   :  { %1450 = vmatprep.subr.bf16.mxu0 %v1627_v14 }
 0x226   :  { %1451 = vmatpush3.bf16.msra.mxu0 %v1628_v16 }
 0x227   :  { %1452 = vmatprep.subr.bf16.mxu0 %v1629_v17 }
 0x22a   :  { %1453 = vmatpush3.bf16.msra.mxu0 %v1630_v18 }
 0x22b   :  { %1454 = vmatprep.subr.bf16.mxu0 %v1631_v19 }
 0x22e   :  { %1455 = vmatpush3.bf16.msra.mxu0 %v1632_v20 }
 0x22f   :  { %1456 = vmatprep.subr.bf16.mxu0 %v1633_v21 }
 0x232   :  { %1457 = vmatpush3.bf16.msra.mxu0 %v1634_v22 }
 0x233   :  { %1458 = vmatprep.subr.bf16.mxu0 %v1635_v23 }
 0x236   :  { %1459 = vmatpush3.bf16.msra.mxu0 %v1636_v24 }
 0x2d9   :  { %v1438_v26 = vpop.f32.mrf.mxu0 }
 0x2db   :  { %v1439_v29 = vpop.f32.mrf.mxu0 }
 0x2dc   :  { %v1440_v30 = vadd.f32 %v1439_v29, %v1438_v26 }
 0x2dd   :  { %v1441_v31 = vpop.f32.mrf.mxu0 }
 0x2de   :  { %v904_v32 = vadd.f32 %v1440_v30, %v1353_v28 }
 0x2df   :  { %v1442_v34 = vpop.f32.mrf.mxu0 }
 0x2e0   :  { %v909_v35 = vmax.f32 %v904_v32, 0.0 }
 0x2e2   :  { %v911_v36 = vpack.c.bf16 %v909_v35, %v909_v35 }
 0x2e4   :  { %1079 = vmatprep.mubr.bf16.mxu0 %v911_v36 }
 0x2e5   :  { %1080 = vmatmul.mubr.bf16.vlgmr.msra.gmra.mxu0 %v910_v37 }
 0x3a5   :  { %v1460_v42 = vpop.f32.mrf.mxu0 }
 0x3a7   :  { %v1461_v44 = vpop.f32.mrf.mxu0 }
 0x3a8   :  { %v1462_v45 = vadd.f32 %v1461_v44, %v1460_v42 }
 0x3a9   :  { %v1463_v46 = vpop.f32.mrf.mxu0 }
 0x3aa   :  { %v1082_v47 = vadd.f32 %v1462_v45, %v1370_v43 }
 0x3ab   :  { %v1464_v48 = vpop.f32.mrf.mxu0 }
 0x3ac   :  { %v1087_v49 = vmax.f32 %v1082_v47, 0.0 }
 0x3ae   :  { %v1088_v50 = vpack.c.bf16 %v1087_v49, %v1087_v49 }
 0x3b0   :  { %1482 = vmatmul.mubr.msk.bf16.vlgmr.msra.gmra.mxu1 %vm1108_vm3, %v1088_v50 }
 0x3b1   :  { %1486 = vmatpush3.bf16.msra.mxu1 %v1221_v51  ;;  %1499 = vmatprep.mubr.msk.bf16.mxu1 %vm1698_vm2, %v1697_v39 }
 0x3b2   :  { %1487 = vmatprep.subr.bf16.mxu1 %v1697_v39 }
 0x3b5   :  { %1488 = vmatpush3.bf16.msra.mxu1 %v1640_v52 }
 0x3b6   :  { %1489 = vmatprep.subr.bf16.mxu1 %v1697_v39 }
 0x3b9   :  { %1490 = vmatpush3.bf16.msra.mxu1 %v1641_v53 }
 0x3ba   :  { %1491 = vmatprep.subr.bf16.mxu1 %v1697_v39 }
 0x3bd   :  { %1492 = vmatpush3.bf16.msra.mxu1 %v1642_v54 }
 0x3be   :  { %1493 = vmatprep.subr.bf16.mxu1 %v1697_v39 }
 0x3c1   :  { %1494 = vmatpush3.bf16.msra.mxu1 %v1643_v56 }
 0x3c2   :  { %1495 = vmatprep.subr.bf16.mxu1 %v1697_v39 }
 0x3c5   :  { %1496 = vmatpush3.bf16.msra.mxu1 %v1644_v58 }
 0x3c6   :  { %1497 = vmatprep.subr.bf16.mxu1 %v1697_v39 }
 0x3c9   :  { %1498 = vmatpush3.bf16.msra.mxu1 %v1645_v59 }
 0x470   :  { %v1149_v61 = vpop.f32.mrf.mxu1 }
 0x471   :  { %v1150_v62 = vadd.f32 %v1387_v60, %v1149_v61 }
 0x472   :  { %v1483_v63 = vpop.f32.mrf.mxu1 }
 0x473   :  { %v1155_v0 = vmax.f32 %v1150_v62, 0.0 }
 0x474   :  { %v1152_v1 = vpop.f32.mrf.mxu1 }
 0x475   :  { %v1156_v2 = vpack.c.bf16 %v1155_v0, %v1155_v0 }
 0x476   :  { %v1484_v3 = vpop.f32.mrf.mxu1 }
 0x477   :  { %1500 = vmatmul.mubr.msk.bf16.vlgmr.msra.gmra.mxu1 %vm1216_vm4, %v1156_v2 }
 0x537   :  { %v1257_v5 = vpop.f32.mrf.mxu1 }
 0x538   :  { %v1258_v6 = vadd.f32 %v1391_v4, %v1257_v5 }
 0x539   :  { %v1501_v7 = vpop.f32.mrf.mxu1 }
 0x53a   :  { %1264 = vrot.lane.b32.xlu0 %v1258_v6, %s1699_s10 }
 0x53b   :  { %v1260_v8 = vpop.f32.mrf.mxu1 }
 0x53d   :  { %v1502_v9 = vpop.f32.mrf.mxu1 }
 0x5ac   :  { %v1265_v10 = vpop.permute.xlu0 %1264 }
 0x5ad   :  { %v1267_v12 = vsel %vm1108_vm3, %v1082_v47, %v1265_v10 }
 0x5ae   :  { %1269 = vst.msk [vmem:[%s1929_s12] sm:$0x3] %vm1268_vm5, %v1267_v12 }
 0x5af   :  { %1274 = vsyncpa [#allocation3], 1 }
 0x5b0   :  { %1275 = vsyncpa [#allocation5], 1 }

</bundles_post_ra>
